<compile_context>
chip_gen: v6e
topology: v6e:2x2x1
jax: 0.10.0
libtpu: 0.0.40
codegen_flags: <defaults>
</compile_context>

<pallas_src>
import functools

import jax
import jax.numpy as jnp
from jax.experimental import pallas as pl
from jax.experimental.pallas import tpu as pltpu

_LANE = 128

# Conservative working budget for tile sizing: fits v7x's 64 MiB physical VMEM and
# the raised scoped limit on v5e/v6e.  vmem_limit_bytes below is set to match.
_VMEM_BUDGET_BYTES = 28 * 1024 * 1024
_VMEM_LIMIT_BYTES = 40 * 1024 * 1024


def _a2c_kernel(num_actions, state_ref, noise_ref, w1_ref, b1_ref,
                wh_ref, bh_ref, out_ref):
    x = state_ref[...]                                               # (TB, D) bf16

    # ---- shared trunk: relu(state @ W1 + b1), f32 accumulation on the MXU ----
    h = jnp.dot(x, w1_ref[...], preferred_element_type=jnp.float32)
    h = jnp.maximum(h + b1_ref[...], 0.0)                            # (TB, H_pad) f32

    # ---- fused policy+value heads: one lane-aligned matmul ----
    heads = jnp.dot(h.astype(jnp.bfloat16), wh_ref[...],
                    preferred_element_type=jnp.float32) + bh_ref[...]  # (TB, A_pad)

    tb, a_pad = heads.shape
    col = jax.lax.broadcasted_iota(jnp.int32, (tb, a_pad), 1)

    value = heads[:, num_actions:num_actions + 1]                    # (TB, 1)
    neg_big = jnp.float32(-1e30)
    logits = jnp.where(col < num_actions, heads, neg_big)            # mask value+pad cols

    # ---- softmax statistics (f32; exp reused by the sampler) ----
    m = jnp.max(logits, axis=-1, keepdims=True)                      # XLU reduce 1
    z = logits - m
    e_z = jnp.exp(z)                                                 # padded cols -> exactly 0
    s = jnp.sum(e_z, axis=-1, keepdims=True)                         # XLU reduce 2
    log_s = jnp.log(s)
    inv_s = 1.0 / s                                                  # exact per-row (TB, 1)

    # ---- exponential-race sample: argmax(e_z / E), E ~ Exp(1) ----
    # Reuses e_z (no Gumbel logs).  Padded columns have e_z == 0 so they never win;
    # the max-logit column has e_z == 1, so the winning score is always > 0.
    e_noise = jnp.maximum(noise_ref[...], jnp.float32(1e-30))        # guard E == 0
    score = e_z / e_noise                                            # (TB, A_pad), >= 0, finite

    # Pack (score, col) into one sortable int32 so a single cross-lane max yields
    # both the winner and its index (score >= 0 -> its bit pattern orders as int32;
    # stomping the low idx_bits only perturbs near-ties: negligible sampling bias).
    idx_bits = (a_pad - 1).bit_length()
    score_bits = jax.lax.bitcast_convert_type(score, jnp.int32)
    packed = (score_bits & jnp.int32(-(1 << idx_bits))) | col
    packed_max = jnp.max(packed, axis=-1, keepdims=True)             # XLU reduce 3
    action = packed_max & jnp.int32((1 << idx_bits) - 1)             # (TB, 1) int32

    z_a = jnp.max(jnp.where(col == action, z, neg_big),
                  axis=-1, keepdims=True)                            # XLU reduce 4
    log_prob = z_a - log_s                                           # (TB, 1)
    entropy = log_s - jnp.sum(e_z * z, axis=-1, keepdims=True) * inv_s  # XLU reduce 5

    # ---- fixed 128-lane output slab: cols [action, log_prob, value, entropy] ----
    # (action round-trips through f32: exact for num_actions < 2^24.)
    out_col = jax.lax.broadcasted_iota(jnp.int32, (tb, 128), 1)
    out_ref[...] = (jnp.where(out_col == 0, action.astype(jnp.float32), 0.0)
                    + jnp.where(out_col == 1, log_prob, 0.0)
                    + jnp.where(out_col == 2, value, 0.0)
                    + jnp.where(out_col == 3, entropy, 0.0))


def prepare_params(params):
    """One-time parameter prep (hoisted out of the per-step path).

    Fuses the policy and value heads into a single lane-aligned weight matrix
    (value in column `num_actions`), zero-pads the hidden dim to a lane granule
    (zero rows/cols are mathematically inert), and casts MXU operands to bf16.
    """
    w1, b1, wp, bp, wv, bv = params
    D, H = w1.shape
    A = wp.shape[1]
    H_pad = _LANE * pl.cdiv(H, _LANE)
    A_pad = _LANE * pl.cdiv(A + 1, _LANE)     # policy cols [0, A), value col A, padding

    w1_p = jnp.zeros((D, H_pad), jnp.float32).at[:, :H].set(w1)
    b1_p = jnp.zeros((1, H_pad), jnp.float32).at[:, :H].set(b1.reshape(1, H))
    w_heads = (jnp.zeros((H_pad, A_pad), jnp.float32)
               .at[:H, :A].set(wp)
               .at[:H, A:A + 1].set(wv))
    b_heads = (jnp.zeros((1, A_pad), jnp.float32)
               .at[:, :A].set(bp.reshape(1, A))
               .at[:, A:A + 1].set(bv.reshape(1, 1)))

    return {
        "w1": w1_p.astype(jnp.bfloat16),      # bf16 MXU operands
        "b1": b1_p,                           # biases stay f32 (added post-accumulation)
        "w_heads": w_heads.astype(jnp.bfloat16),
        "b_heads": b_heads,
        "num_actions": A,
    }


def _pick_tb(B, D, H_pad, A_pad):
    """Largest batch tile that fits the VMEM budget; keeps >= ~8 tiles for big B."""
    per_row = (2 * D * 2            # state stream, bf16, double-buffered
               + 2 * A_pad * 4      # exponential noise stream, f32, double-buffered
               + 2 * 128 * 4        # output slab, f32, double-buffered
               + H_pad * 4          # hidden activations
               + 10 * A_pad * 4)    # live epilogue temporaries (heads, z, e_z, score, ...)
    weights = 2 * (D * H_pad * 2 + H_pad * 4 + H_pad * A_pad * 2 + A_pad * 4)
    budget = max(_VMEM_BUDGET_BYTES - weights, 8 * per_row)
    cap = int(min(1024, budget // per_row))
    cap = max(8, cap - cap % 8)
    if B <= cap and B < 512:
        return B                    # small batch: single tile (grid overhead dominates)
    # Big batch: keep >= ~8 tiles so the state/output pipeline overlaps compute and
    # v7x's two TensorCores both get work under dimension_semantics=("parallel",).
    cap = min(cap, max(64, ((B // 8) // 8) * 8))
    for tb in range(min(cap, (B // 8) * 8), 7, -8):
        if B % tb == 0:
            return tb
    return B                        # no aligned divisor: monolithic fallback


def a2c_forward(prepped, state, key):
    """One A2C agent step. Returns (action, log_prob, value, entropy).

    `prepped` comes from prepare_params (call once per weight update); `key` drives
    the categorical sample; `state` should be bf16 from the producer (f32 is cast
    as a fallback).
    """
    w1, b1 = prepped["w1"], prepped["b1"]
    wh, bh = prepped["w_heads"], prepped["b_heads"]
    A = prepped["num_actions"]
    D, H_pad = w1.shape
    A_pad = wh.shape[1]
    B = state.shape[0]

    if state.dtype != jnp.bfloat16:
        # Prefer a bf16 producer: state is the dominant streamed input.
        state = state.astype(jnp.bfloat16)

    # Per-element Exp(1) noise for the sampling race (counter-based jax.random:
    # no adjacent-seed correlation across batch tiles).
    noise = jax.random.exponential(key, (B, A_pad), dtype=jnp.float32)

    TB = _pick_tb(B, D, H_pad, A_pad)
    grid = (pl.cdiv(B, TB),)

    slab = pl.pallas_call(
        functools.partial(_a2c_kernel, A),
        out_shape=jax.ShapeDtypeStruct((B, 128), jnp.float32),
        grid=grid,
        in_specs=[
            pl.BlockSpec((TB, D), lambda i: (i, 0)),          # state tile (streamed)
            pl.BlockSpec((TB, A_pad), lambda i: (i, 0)),      # Exp(1) noise tile
            pl.BlockSpec((D, H_pad), lambda i: (0, 0)),       # W1 (VMEM-resident)
            pl.BlockSpec((1, H_pad), lambda i: (0, 0)),       # b1
            pl.BlockSpec((H_pad, A_pad), lambda i: (0, 0)),   # fused heads W
            pl.BlockSpec((1, A_pad), lambda i: (0, 0)),       # fused heads b
        ],
        out_specs=pl.BlockSpec((TB, 128), lambda i: (i, 0)),  # lane-dense 128-wide slab
        compiler_params=pltpu.CompilerParams(
            dimension_semantics=("parallel",),                # megacore batch sharding
            vmem_limit_bytes=_VMEM_LIMIT_BYTES),
    )(state, noise, w1, b1, wh, bh)

    # Split the lane-dense slab; match torch semantics:
    # action/log_prob are (B,), value is (B, 1), entropy reshaped to value.shape.
    action = slab[:, 0].astype(jnp.int32)
    log_prob = slab[:, 1]
    value = slab[:, 2:3]
    entropy = slab[:, 3:4]
    return action, log_prob, value, entropy


def init_params(key, state_dim, hidden_dim, num_actions):
    k1, k2, k3 = jax.random.split(key, 3)
    w1 = 0.1 * jax.random.normal(k1, (state_dim, hidden_dim), jnp.float32)
    b1 = jnp.zeros((1, hidden_dim), jnp.float32)
    wp = 0.1 * jax.random.normal(k2, (hidden_dim, num_actions), jnp.float32)
    bp = jnp.zeros((1, num_actions), jnp.float32)
    wv = 0.1 * jax.random.normal(k3, (hidden_dim, 1), jnp.float32)
    bv = jnp.zeros((1, 1), jnp.float32)
    return (w1, b1, wp, bp, wv, bv)


if __name__ == "__main__":
    B, D, H, A = 8, 16, 32, 8   # batch, state_dim, hidden, num_actions

    key = jax.random.PRNGKey(0)
    k_state, k_params, k_noise = jax.random.split(key, 3)

    # Producer emits bf16 state (halves the dominant streamed input).
    state = jax.random.normal(k_state, (B, D), jnp.float32).astype(jnp.bfloat16)
    params = init_params(k_params, D, H, A)
    prepped = prepare_params(params)        # one-time: fused heads + padding + bf16 casts

    action, log_prob, value, entropy = a2c_forward(prepped, state, k_noise)
    jax.block_until_ready((action, log_prob, value, entropy))

    assert action.shape == (B,) and action.dtype == jnp.int32
    assert bool(jnp.all(action >= 0)) and bool(jnp.all(action < A))
    assert log_prob.shape == (B,)
    assert value.shape == (B, 1)
    assert entropy.shape == value.shape
    assert bool(jnp.all(log_prob <= 1e-5))
    assert bool(jnp.all(entropy >= -1e-3)) and bool(jnp.all(entropy <= jnp.log(A) + 1e-3))
    # TODO(synk): A2C.update() / add_trans / save_model / load_model are host-side
    # training-loop and I/O code (optimizer, transition deque) and are not part of
    # the forward kernel.
    print("KERNEL_OK")
</pallas_src>

<mosaic_0001>
module attributes {stable_mosaic.version = 11 : i64} {
  func.func @_a2c_kernel(%arg0: i32, %arg1: memref<8x16xbf16, #tpu.memory_space<vmem>>, %arg2: memref<8x128xf32, #tpu.memory_space<vmem>>, %arg3: memref<16x128xbf16, #tpu.memory_space<vmem>>, %arg4: memref<1x128xf32, #tpu.memory_space<vmem>>, %arg5: memref<128x128xbf16, #tpu.memory_space<vmem>>, %arg6: memref<1x128xf32, #tpu.memory_space<vmem>>, %arg7: memref<8x128xf32, #tpu.memory_space<vmem>>) attributes {dimension_semantics = [#tpu.dimension_semantics<parallel>], iteration_bounds = array<i64: 1>, scalar_prefetch = 0 : i64, scratch_operands = 0 : i64, tpu.core_type = #tpu.core_type<tc>, window_params = [{transform_indices = @transform_0, window_bounds = array<i64: 8, 16>}, {transform_indices = @transform_1, window_bounds = array<i64: 8, 128>}, {pipeline_mode = #tpu.pipeline_mode<synchronous>, transform_indices = @transform_2, window_bounds = array<i64: 16, 128>}, {pipeline_mode = #tpu.pipeline_mode<synchronous>, transform_indices = @transform_3, window_bounds = array<i64: 1, 128>}, {pipeline_mode = #tpu.pipeline_mode<synchronous>, transform_indices = @transform_4, window_bounds = array<i64: 128, 128>}, {pipeline_mode = #tpu.pipeline_mode<synchronous>, transform_indices = @transform_5, window_bounds = array<i64: 1, 128>}, {transform_indices = @transform_6, window_bounds = array<i64: 8, 128>}]} {
    %c0 = arith.constant 0 : index
    %c0_0 = arith.constant 0 : index
    %0 = vector.load %arg1[%c0, %c0_0] : memref<8x16xbf16, #tpu.memory_space<vmem>>, vector<8x16xbf16>
    %c0_1 = arith.constant 0 : index
    %c0_2 = arith.constant 0 : index
    %1 = vector.load %arg3[%c0_1, %c0_2] : memref<16x128xbf16, #tpu.memory_space<vmem>>, vector<16x128xbf16>
    %cst = arith.constant dense<0.000000e+00> : vector<8x128xf32>
    %2 = tpu.matmul %0, %1, %cst {dimension_numbers = #tpu.dot_dimension_numbers<[1], [0], [0], [1], [0, 0, 1, 1], [], []>} : vector<8x16xbf16>, vector<16x128xbf16>, vector<8x128xf32> -> vector<8x128xf32>
    %c0_3 = arith.constant 0 : index
    %c0_4 = arith.constant 0 : index
    %3 = vector.load %arg4[%c0_3, %c0_4] : memref<1x128xf32, #tpu.memory_space<vmem>>, vector<1x128xf32>
    %4 = vector.broadcast %3 : vector<1x128xf32> to vector<8x128xf32>
    %5 = arith.addf %2, %4 : vector<8x128xf32>
    %cst_5 = arith.constant 0.000000e+00 : f32
    %6 = vector.broadcast %cst_5 : f32 to vector<8x128xf32>
    %7 = arith.maximumf %5, %6 : vector<8x128xf32>
    %8 = arith.truncf %7 : vector<8x128xf32> to vector<8x128xbf16>
    %c0_6 = arith.constant 0 : index
    %c0_7 = arith.constant 0 : index
    %9 = vector.load %arg5[%c0_6, %c0_7] : memref<128x128xbf16, #tpu.memory_space<vmem>>, vector<128x128xbf16>
    %cst_8 = arith.constant dense<0.000000e+00> : vector<8x128xf32>
    %10 = tpu.matmul %8, %9, %cst_8 {dimension_numbers = #tpu.dot_dimension_numbers<[1], [0], [0], [1], [0, 0, 1, 1], [], []>} : vector<8x128xbf16>, vector<128x128xbf16>, vector<8x128xf32> -> vector<8x128xf32>
    %c0_9 = arith.constant 0 : index
    %c0_10 = arith.constant 0 : index
    %11 = vector.load %arg6[%c0_9, %c0_10] : memref<1x128xf32, #tpu.memory_space<vmem>>, vector<1x128xf32>
    %12 = vector.broadcast %11 : vector<1x128xf32> to vector<8x128xf32>
    %13 = arith.addf %10, %12 : vector<8x128xf32>
    %14 = tpu.iota {dimensions = array<i32: 1>} : vector<8x128xi32>
    %15 = vector.extract_strided_slice %13 {offsets = [0, 8], sizes = [8, 1], strides = [1, 1]} : vector<8x128xf32> to vector<8x1xf32>
    %c8_i32 = arith.constant 8 : i32
    %16 = vector.broadcast %c8_i32 : i32 to vector<8x128xi32>
    %17 = arith.cmpi slt, %14, %16 : vector<8x128xi32>
    %cst_11 = arith.constant -1.000000e+30 : f32
    %18 = vector.broadcast %cst_11 : f32 to vector<8x128xf32>
    %19 = arith.select %17, %13, %18 : vector<8x128xi1>, vector<8x128xf32>
    %cst_12 = arith.constant dense<0xFF800000> : vector<8xf32>
    %20 = vector.multi_reduction <maximumf>, %19, %cst_12 [1] : vector<8x128xf32> to vector<8xf32>
    %21 = vector.shape_cast %20 : vector<8xf32> to vector<8x1xf32>
    %22 = vector.broadcast %21 : vector<8x1xf32> to vector<8x128xf32>
    %23 = arith.subf %19, %22 : vector<8x128xf32>
    %24 = math.exp %23 : vector<8x128xf32>
    %cst_13 = arith.constant dense<0.000000e+00> : vector<8xf32>
    %25 = vector.multi_reduction <add>, %24, %cst_13 [1] : vector<8x128xf32> to vector<8xf32>
    %26 = vector.shape_cast %25 : vector<8xf32> to vector<8x1xf32>
    %27 = math.log %26 : vector<8x1xf32>
    %cst_14 = arith.constant 1.000000e+00 : f32
    %28 = vector.broadcast %cst_14 : f32 to vector<8x1xf32>
    %29 = arith.divf %28, %26 : vector<8x1xf32>
    %c0_15 = arith.constant 0 : index
    %c0_16 = arith.constant 0 : index
    %30 = vector.load %arg2[%c0_15, %c0_16] : memref<8x128xf32, #tpu.memory_space<vmem>>, vector<8x128xf32>
    %cst_17 = arith.constant 1.000000e-30 : f32
    %31 = vector.broadcast %cst_17 : f32 to vector<8x128xf32>
    %32 = arith.maximumf %30, %31 : vector<8x128xf32>
    %33 = arith.divf %24, %32 : vector<8x128xf32>
    %34 = tpu.bitcast %33 : vector<8x128xf32> -> vector<8x128xi32>
    %c-128_i32 = arith.constant -128 : i32
    %35 = vector.broadcast %c-128_i32 : i32 to vector<8x128xi32>
    %36 = arith.andi %34, %35 : vector<8x128xi32>
    %37 = arith.ori %36, %14 : vector<8x128xi32>
    %cst_18 = arith.constant dense<-2147483648> : vector<8xi32>
    %38 = vector.multi_reduction <maxsi>, %37, %cst_18 [1] : vector<8x128xi32> to vector<8xi32>
    %39 = vector.shape_cast %38 : vector<8xi32> to vector<8x1xi32>
    %c127_i32 = arith.constant 127 : i32
    %40 = vector.broadcast %c127_i32 : i32 to vector<8x1xi32>
    %41 = arith.andi %39, %40 : vector<8x1xi32>
    %42 = vector.broadcast %41 : vector<8x1xi32> to vector<8x128xi32>
    %43 = arith.cmpi eq, %14, %42 : vector<8x128xi32>
    %cst_19 = arith.constant -1.000000e+30 : f32
    %44 = vector.broadcast %cst_19 : f32 to vector<8x128xf32>
    %45 = arith.select %43, %23, %44 : vector<8x128xi1>, vector<8x128xf32>
    %cst_20 = arith.constant dense<0xFF800000> : vector<8xf32>
    %46 = vector.multi_reduction <maximumf>, %45, %cst_20 [1] : vector<8x128xf32> to vector<8xf32>
    %47 = vector.shape_cast %46 : vector<8xf32> to vector<8x1xf32>
    %48 = arith.subf %47, %27 : vector<8x1xf32>
    %49 = arith.mulf %24, %23 : vector<8x128xf32>
    %cst_21 = arith.constant dense<0.000000e+00> : vector<8xf32>
    %50 = vector.multi_reduction <add>, %49, %cst_21 [1] : vector<8x128xf32> to vector<8xf32>
    %51 = vector.shape_cast %50 : vector<8xf32> to vector<8x1xf32>
    %52 = arith.mulf %51, %29 : vector<8x1xf32>
    %53 = arith.subf %27, %52 : vector<8x1xf32>
    %54 = tpu.iota {dimensions = array<i32: 1>} : vector<8x128xi32>
    %c0_i32 = arith.constant 0 : i32
    %55 = vector.broadcast %c0_i32 : i32 to vector<8x128xi32>
    %56 = arith.cmpi eq, %54, %55 : vector<8x128xi32>
    %57 = arith.sitofp %41 : vector<8x1xi32> to vector<8x1xf32>
    %cst_22 = arith.constant 0.000000e+00 : f32
    %58 = vector.shape_cast %57 : vector<8x1xf32> to vector<8x1xf32>
    %59 = vector.broadcast %58 : vector<8x1xf32> to vector<8x128xf32>
    %60 = vector.broadcast %cst_22 : f32 to vector<8x128xf32>
    %61 = arith.select %56, %59, %60 : vector<8x128xi1>, vector<8x128xf32>
    %c1_i32 = arith.constant 1 : i32
    %62 = vector.broadcast %c1_i32 : i32 to vector<8x128xi32>
    %63 = arith.cmpi eq, %54, %62 : vector<8x128xi32>
    %cst_23 = arith.constant 0.000000e+00 : f32
    %64 = vector.shape_cast %48 : vector<8x1xf32> to vector<8x1xf32>
    %65 = vector.broadcast %64 : vector<8x1xf32> to vector<8x128xf32>
    %66 = vector.broadcast %cst_23 : f32 to vector<8x128xf32>
    %67 = arith.select %63, %65, %66 : vector<8x128xi1>, vector<8x128xf32>
    %68 = arith.addf %61, %67 : vector<8x128xf32>
    %c2_i32 = arith.constant 2 : i32
    %69 = vector.broadcast %c2_i32 : i32 to vector<8x128xi32>
    %70 = arith.cmpi eq, %54, %69 : vector<8x128xi32>
    %cst_24 = arith.constant 0.000000e+00 : f32
    %71 = vector.shape_cast %15 : vector<8x1xf32> to vector<8x1xf32>
    %72 = vector.broadcast %71 : vector<8x1xf32> to vector<8x128xf32>
    %73 = vector.broadcast %cst_24 : f32 to vector<8x128xf32>
    %74 = arith.select %70, %72, %73 : vector<8x128xi1>, vector<8x128xf32>
    %75 = arith.addf %68, %74 : vector<8x128xf32>
    %c3_i32 = arith.constant 3 : i32
    %76 = vector.broadcast %c3_i32 : i32 to vector<8x128xi32>
    %77 = arith.cmpi eq, %54, %76 : vector<8x128xi32>
    %cst_25 = arith.constant 0.000000e+00 : f32
    %78 = vector.shape_cast %53 : vector<8x1xf32> to vector<8x1xf32>
    %79 = vector.broadcast %78 : vector<8x1xf32> to vector<8x128xf32>
    %80 = vector.broadcast %cst_25 : f32 to vector<8x128xf32>
    %81 = arith.select %77, %79, %80 : vector<8x128xi1>, vector<8x128xf32>
    %82 = arith.addf %75, %81 : vector<8x128xf32>
    %c0_26 = arith.constant 0 : index
    %c0_27 = arith.constant 0 : index
    %83 = vector.load %arg7[%c0_26, %c0_27] : memref<8x128xf32, #tpu.memory_space<vmem>>, vector<8x128xf32>
    tpu.vector_store %arg7[%c0_26, %c0_27], %82 {strides = array<i32>} : memref<8x128xf32, #tpu.memory_space<vmem>>, vector<8x128xf32>,
    return
  }
  func.func @transform_0(%arg0: i32) -> (i32, i32) {
    %c0_i32 = arith.constant 0 : i32
    %c0_i32_0 = arith.constant 0 : i32
    return %arg0, %c0_i32 : i32, i32
  }
  func.func @transform_1(%arg0: i32) -> (i32, i32) {
    %c0_i32 = arith.constant 0 : i32
    %c0_i32_0 = arith.constant 0 : i32
    return %arg0, %c0_i32 : i32, i32
  }
  func.func @transform_2(%arg0: i32) -> (i32, i32) {
    %c0_i32 = arith.constant 0 : i32
    %c0_i32_0 = arith.constant 0 : i32
    %c0_i32_1 = arith.constant 0 : i32
    return %c0_i32, %c0_i32_0 : i32, i32
  }
  func.func @transform_3(%arg0: i32) -> (i32, i32) {
    %c0_i32 = arith.constant 0 : i32
    %c0_i32_0 = arith.constant 0 : i32
    %c0_i32_1 = arith.constant 0 : i32
    return %c0_i32, %c0_i32_0 : i32, i32
  }
  func.func @transform_4(%arg0: i32) -> (i32, i32) {
    %c0_i32 = arith.constant 0 : i32
    %c0_i32_0 = arith.constant 0 : i32
    %c0_i32_1 = arith.constant 0 : i32
    return %c0_i32, %c0_i32_0 : i32, i32
  }
  func.func @transform_5(%arg0: i32) -> (i32, i32) {
    %c0_i32 = arith.constant 0 : i32
    %c0_i32_0 = arith.constant 0 : i32
    %c0_i32_1 = arith.constant 0 : i32
    return %c0_i32, %c0_i32_0 : i32, i32
  }
  func.func @transform_6(%arg0: i32) -> (i32, i32) {
    %c0_i32 = arith.constant 0 : i32
    %c0_i32_0 = arith.constant 0 : i32
    return %arg0, %c0_i32 : i32, i32
  }
}

</mosaic_0001>

<bundles_post_ra>
// kernel: tpu_custom_call.1
= control target key start
LH: loop header
LB: loop body
LE: loop exit
PB: predicated region body
PF: predicated region fallthrough
CT: control target
= control target key end

     0   :  { %11 = vsyncpa [#allocation3], 0  ;;  %s591_s0 = inlined_call_operand.hbm [shape: bf16[8,16], index: 0, kind: input, shape index: {}]   ;;  %s592_s1 = inlined_call_operand.hbm [shape: f32[8,128], index: 1, kind: input, shape index: {}]   ;;  %s593_s2 = inlined_call_operand.hbm [shape: bf16[16,128], index: 2, kind: input, shape index: {}]   ;;  %s594_s3 = inlined_call_operand.vmem [shape: f32[1,128], index: 3, kind: input, shape index: {}]   ;;  %s595_s4 = inlined_call_operand.hbm [shape: bf16[128,128], index: 4, kind: input, shape index: {}]   ;;  %s596_s5 = inlined_call_operand.vmem [shape: f32[1,128], index: 5, kind: input, shape index: {}]   ;;  %s597_s6 = inlined_call_operand.hbm [shape: f32[8,128], index: 6, kind: output, shape index: {}]  }
   0x1   :  { %12 = vsyncpa [#allocation6], 0 }
   0x2   :  { %13 = vsyncpa [#allocation9], 0 }
   0x3   :  { %14 = vsyncpa [#allocation4], 0  ;;  %s516_s21 = smov [#allocation5]   ;;  %s517_s23 = smov [#allocation2]  }
   0x4   :  { %s31_s22 = sshll.u32 %s516_s21, 4  ;;  %s21_s24 = sshll.u32 %s517_s23, 4  ;;  %s32_s22 = int_to_ptr.vmem [resolvable:$true] %s31_s22  ;;  %s22_s24 = int_to_ptr.vmem [resolvable:$true] %s21_s24 }
   0x5   :  { %s416_s25 = scalar_lea.vmem %s32_s22, 128  ;;  %p421_p1 = scmp.lt.s32.totalorder %s32_s22, %s32_s22 }
   0x6   :  { %p417_p0 = scmp.ne.s32.totalorder %s32_s22, %s416_s25  ;;  %p422_p2 = scmp.lt.s32.totalorder %s416_s25, %s416_s25 }
   0x8   :  { %p423_p3 = por %p422_p2, %p421_p1 }
   0xa   :  { %p424_p4 = pnand %p423_p3, %p417_p0 }
   0xc   :  { %427 = shalt.err (!%p424_p4)
}
   0xd   :  { %34 = dma.hbm_to_vmem [thread:$0]  %s592_s1, 128, %s32_s22, [#allocation6]  }
   0xe   :  { %s436_s28 = scalar_lea.vmem %s22_s24, 64  ;;  %p441_p6 = scmp.lt.s32.totalorder %s22_s24, %s22_s24 }
   0xf   :  { %p437_p5 = scmp.ne.s32.totalorder %s22_s24, %s436_s28  ;;  %p442_p7 = scmp.lt.s32.totalorder %s436_s28, %s436_s28 }
  0x11   :  { %p443_p8 = por %p442_p7, %p441_p6 }
  0x13   :  { %p444_p9 = pnand %p443_p8, %p437_p5 }
  0x15   :  { %447 = shalt.err (!%p444_p9)
}
  0x16   :  { %24 = dma.hbm_to_vmem [thread:$0]  %s591_s0, 64, %s22_s24, [#allocation3]  }
  0x17   :  { %s518_s7 = smov [#allocation7]  }
  0x18   :  { %s40_s8 = sshll.u32 %s518_s7, 4  ;;  %s41_s8 = int_to_ptr.vmem [resolvable:$true] %s40_s8 }
  0x19   :  { %s456_s9 = scalar_lea.vmem %s41_s8, 128  ;;  %p461_p11 = scmp.lt.s32.totalorder %s41_s8, %s41_s8 }
  0x1a   :  { %p457_p10 = scmp.ne.s32.totalorder %s41_s8, %s456_s9  ;;  %p462_p12 = scmp.lt.s32.totalorder %s456_s9, %s456_s9 }
  0x1c   :  { %p463_p13 = por %p462_p12, %p461_p11 }
  0x1e   :  { %p464_p0 = pnand %p463_p13, %p457_p10 }
  0x20   :  { %467 = shalt.err (!%p464_p0)
}
  0x21   :  { %s519_s1 = smov 64   ;;  %s520_s10 = smov 4  }
  0x22   :  { %46 = dma.hbm_to_vmem [thread:$0]  %s593_s2, 128, %s41_s8, [#allocation6], %s519_s1, %s519_s1, %s520_s10  }
  0x23   :  { %s521_s13 = smov [#allocation8]  }
  0x24   :  { %s54_s14 = sshll.u32 %s521_s13, 4  ;;  %s55_s14 = int_to_ptr.vmem [resolvable:$true] %s54_s14 }
  0x25   :  { %s476_s0 = scalar_lea.vmem %s55_s14, 1024  ;;  %p481_p2 = scmp.lt.s32.totalorder %s55_s14, %s55_s14 }
  0x26   :  { %p477_p1 = scmp.ne.s32.totalorder %s55_s14, %s476_s0  ;;  %p482_p3 = scmp.lt.s32.totalorder %s476_s0, %s476_s0 }
  0x28   :  { %p483_p4 = por %p482_p3, %p481_p2 }
  0x2a   :  { %p484_p5 = pnand %p483_p4, %p477_p1 }
  0x2c   :  { %487 = shalt.err (!%p484_p5)
}
  0x2d   :  { %60 = dma.hbm_to_vmem [thread:$0]  %s595_s4, 1024, %s55_s14, [#allocation9], %s519_s1, %s519_s1, %s520_s10  }
  0x2e   :  { %508 = dma.done.wait [#allocation3], 64  }
  0x2f   :  { %509 = vsyncadd [#allocation3], 4294967232 }
  0x30   :  { %510 = dma.done.wait [#allocation6], 256  }
  0x31   :  { %511 = vsyncadd [#allocation6], 4294967040 }
  0x32   :  { %512 = dma.done.wait [#allocation9], 1024  }
  0x33   :  { %513 = vsyncadd [#allocation9], 4294966272  ;;  %v522_v0 = vmov 0.0   ;;  %vm523_vm0 = vmmov 0   ;;  %v391_v1 = vld [vmem:[#allocation7] sm:$0xff]   ;;  %vm92_vm1 = vcmask 130048   ;;  %v249_v19 = vlaneseq }
  0x34   :  { %354 = vmatprep.subr.bf16.mxu0 %v522_v0  ;;  %356 = vmatprep.mubr.msk.bf16.mxu0 %vm523_vm0, %v522_v0  ;;  %v76_v2 = vld [vmem:[#allocation2] sm:$0xf]  ;;  %v392_v3 = vld [vmem:[#allocation8 + $0x38] sm:$0xff]   ;;  %v393_v4 = vld [vmem:[#allocation8 + $0x30] sm:$0xff]   ;;  %v524_v45 = vmov 8  }
  0x35   :  { %360 = vmatprep.subr.bf16.mxu1 %v522_v0  ;;  %376 = vmatprep.mubr.msk.bf16.mxu1 %vm523_vm0, %v522_v0  ;;  %v394_v5 = vld [vmem:[#allocation8 + $0x28] sm:$0xff]   ;;  %v395_v6 = vld [vmem:[#allocation8 + $0x20] sm:$0xff]   ;;  %v396_v7 = vld [vmem:[#allocation8 + $0x18] sm:$0xff]   ;;  %v576_v20 = vand.u32 127, %v249_v19 }
  0x36   :  { %355 = vmatpush3.bf16.msra.mxu0 %v391_v1  ;;  %361 = vmatpush3.bf16.msra.mxu1 %v392_v3  ;;  %v397_v8 = vld [vmem:[#allocation8 + $0x10] sm:$0xff]   ;;  %v398_v9 = vld [vmem:[#allocation8 + $0x8] sm:$0xff]   ;;  %v399_v10 = vld [vmem:[#allocation8] sm:$0xff]  }
  0x37   :  { %362 = vmatprep.subr.bf16.mxu1 %v522_v0  ;;  %v331_v11 = vld [vmem:[%s594_s3] ss:$0 sm:$0xff]  ;;  %vm251_vm2 = vcmp.lt.s32.totalorder %v576_v20, 8  ;;  %v264_v28 = vld [vmem:[#allocation5] sm:$0xff]  ;;  %390 = vset.pattern.permute.xlu0 %v524_v45  ;;  %vm299_vm5 = vcmp.eq.s32.totalorder %v576_v20, 1  ;;  %vm296_vm6 = vcmp.eq.s32.totalorder %v576_v20, 0 }
  0x38   :  { %v334_v21 = vld [vmem:[%s596_s5] ss:$0 sm:$0xff]  ;;  %v265_v29 = vmax.f32 %v264_v28, 1e-30  ;;  %vm302_vm7 = vcmp.eq.s32.totalorder %v576_v20, 2  ;;  %vm310_vm8 = vcmp.eq.s32.totalorder %v576_v20, 3 }
  0x39   :  { %357 = vmatmul.mubr.msk.bf16.vlgmr.msra.gmra.mxu0 %vm92_vm1, %v76_v2  ;;  %s525_s3 = smov [#allocation10]  }
  0x3a   :  { %363 = vmatpush3.bf16.msra.mxu1 %v393_v4  ;;  %400 = vrcp.f32 %v265_v29  ;;  %s320_s5 = sshll.u32 %s525_s3, 4  ;;  %s321_s5 = int_to_ptr.vmem [resolvable:$true] %s320_s5 }
  0x3b   :  { %364 = vmatprep.subr.bf16.mxu1 %v522_v0  ;;  %s488_s19 = scalar_lea.vmem %s321_s5, 128  ;;  %p493_p7 = scmp.lt.s32.totalorder %s321_s5, %s321_s5 }
  0x3c   :  { %p489_p6 = scmp.ne.s32.totalorder %s321_s5, %s488_s19  ;;  %p494_p8 = scmp.lt.s32.totalorder %s488_s19, %s488_s19 }
  0x3e   :  { %365 = vmatpush3.bf16.msra.mxu1 %v394_v5  ;;  %p495_p9 = por %p494_p8, %p493_p7 }
  0x3f   :  { %366 = vmatprep.subr.bf16.mxu1 %v522_v0 }
  0x40   :  { %p496_p10 = pnand %p495_p9, %p489_p6 }
  0x42   :  { %367 = vmatpush3.bf16.msra.mxu1 %v395_v6 }
  0x43   :  { %368 = vmatprep.subr.bf16.mxu1 %v522_v0 }
  0x46   :  { %369 = vmatpush3.bf16.msra.mxu1 %v396_v7 }
  0x47   :  { %370 = vmatprep.subr.bf16.mxu1 %v522_v0  ;;  %v401_v33 = vpop.eup %400 }
  0x4a   :  { %371 = vmatpush3.bf16.msra.mxu1 %v397_v8 }
  0x4b   :  { %372 = vmatprep.subr.bf16.mxu1 %v522_v0 }
  0x4e   :  { %373 = vmatpush3.bf16.msra.mxu1 %v398_v9 }
  0x4f   :  { %374 = vmatprep.subr.bf16.mxu1 %v522_v0 }
  0x52   :  { %375 = vmatpush3.bf16.msra.mxu1 %v399_v10 }
  0xf9   :  { %v130_v12 = vpop.f32.mrf.mxu0 }
  0xfa   :  { %v131_v13 = vadd.f32 %v331_v11, %v130_v12 }
  0xfb   :  { %v358_v14 = vpop.f32.mrf.mxu0 }
  0xfc   :  { %v136_v15 = vmax.f32 %v131_v13, 0.0 }
  0xfd   :  { %v133_v16 = vpop.f32.mrf.mxu0 }
  0xfe   :  { %v137_v17 = vpack.c.bf16 %v136_v15, %v136_v15 }
  0xff   :  { %v359_v18 = vpop.f32.mrf.mxu0 }
 0x100   :  { %377 = vmatmul.mubr.bf16.vlgmr.msra.gmra.mxu1 %v137_v17 }
 0x1c0   :  { %v243_v22 = vpop.f32.mrf.mxu1 }
 0x1c1   :  { %v244_v23 = vadd.f32 %v334_v21, %v243_v22 }
 0x1c2   :  { %v378_v24 = vpop.f32.mrf.mxu1 }
 0x1c3   :  { %v252_v25 = vsel %vm251_vm2, %v244_v23, -1e+30 }
 0x1c4   :  { %253 = vmax.xlane.f32.xlu0 %v252_v25  ;;  %v246_v26 = vpop.f32.mrf.mxu1 }
 0x1c6   :  { %v379_v27 = vpop.f32.mrf.mxu1 }
 0x24d   :  { %v254_v30 = vpop.xlane.xlu0 %253 }
 0x24e   :  { %v255_v31 = vsub.f32 %v252_v25, %v254_v30 }
 0x250   :  { %v256_v32 = vmul.f32 1.442695, %v255_v31 }
 0x252   :  { %402 = vpow2.f32 %v256_v32 }
 0x25f   :  { %v403_v34 = vpop.eup %402 }
 0x260   :  { %v267_v35 = vmul.f32 %v403_v34, %v401_v33  ;;  %v291_v44 = vmul.f32 %v403_v34, %v255_v31 }
 0x262   :  { %v269_v36 = vand.u32 4294967168, %v267_v35 }
 0x264   :  { %v270_v37 = vor.u32 %v269_v36, %v576_v20 }
 0x266   :  { %v272_v38 = vshra.s32 %v270_v37, 16  ;;  %v271_v40 = vand.u32 65535, %v270_v37 }
 0x268   :  { %v274_v39 = vcvt.s32.f32 %v272_v38  ;;  %v273_v42 = vcvt.s32.f32 %v271_v40 }
 0x26a   :  { %275 = vmax.xlane.f32.xlu0 %v274_v39 }
 0x2f3   :  { %v276_v41 = vpop.xlane.xlu0 %275 }
 0x2f4   :  { %vm277_vm3 = vcmp.eq.f32.partialorder %v274_v39, %v276_v41  ;;  %v282_v46 = vcvt.f32.s32 %v276_v41 }
 0x2f5   :  { %v278_v43 = vsel %vm277_vm3, %v273_v42, -inf }
 0x2f6   :  { %279 = vmax.xlane.f32.xlu1 %v278_v43  ;;  %v283_v48 = vshll.u32 %v282_v46, 16 }
 0x2fa   :  { %258 = vadd.xlane.f32.xlu1 %v403_v34 }
 0x2fe   :  { %292 = vadd.xlane.f32.xlu1 %v291_v44 }
 0x37f   :  { %v280_v47 = vpop.xlane.xlu1 %279 }
 0x380   :  { %v281_v49 = vcvt.f32.s32 %v280_v47 }
 0x382   :  { %v284_v50 = vadd.s32 %v283_v48, %v281_v49 }
 0x383   :  { %v259_v53 = vpop.xlane.xlu1 %258 }
 0x384   :  { %v285_v51 = vand.u32 127, %v284_v50  ;;  %404 = vlog2.f32 %v259_v53 }
 0x385   :  { %406 = vrcp.f32 %v259_v53 }
 0x386   :  { %vm286_vm4 = vcmp.eq.s32.totalorder %v576_v20, %v285_v51  ;;  %v297_v60 = vcvt.s32.f32 %v285_v51 }
 0x387   :  { %v287_v52 = vsel %vm286_vm4, %v255_v31, -1e+30  ;;  %v293_v59 = vpop.xlane.xlu1 %292 }
 0x388   :  { %288 = vmax.xlane.f32.xlu0 %v287_v52  ;;  %v298_v0 = vsel %vm296_vm6, %v297_v60, 0.0 }
 0x391   :  { %v405_v54 = vpop.eup %404 }
 0x392   :  { %v261_v55 = vmul.f32 0.6931472, %v405_v54  ;;  %v407_v56 = vpop.eup %406 }
 0x393   :  { %v294_v61 = vmul.f32 %v407_v56, %v293_v59 }
 0x395   :  { %v295_v63 = vsub.f32 %v261_v55, %v294_v61 }
 0x397   :  { %v311_v5 = vsel %vm310_vm8, %v295_v63, 0.0 }
 0x39e   :  { %305 = vperm.xlu0 %390, %v244_v23  }
 0x411   :  { %v289_v57 = vpop.xlane.xlu0 %288 }
 0x412   :  { %v290_v58 = vsub.f32 %v289_v57, %v261_v55 }
 0x414   :  { %v300_v62 = vsel %vm299_vm5, %v290_v58, 0.0 }
 0x415   :  { %v301_v2 = vadd.f32 %v300_v62, %v298_v0 }
 0x419   :  { %v306_v1 = vpop.permute.xlu0 %305 }
 0x41a   :  { %v308_v3 = vsel %vm302_vm7, %v306_v1, 0.0 }
 0x41b   :  { %v309_v4 = vadd.f32 %v308_v3, %v301_v2 }
 0x41d   :  { %v312_v6 = vadd.f32 %v311_v5, %v309_v4 }
 0x41f   :  { %313 = vst [vmem:[#allocation10] sm:$0xff] %v312_v6 }
 0x420   :  { %499 = shalt.err (!%p496_p10)
}
 0x421   :  { %323 = dma.vmem_to_hbm [thread:$0]  %s321_s5, 128, %s597_s6, [#allocation4]  }
 0x422   :  { %514 = dma.done.wait [#allocation4], 128  }
 0x423   :  { %515 = vsyncadd [#allocation4], 4294967168 }
 0x424   :  { %327 = vsyncpa [#allocation3], 1 }
 0x425   :  { %328 = vsyncpa [#allocation6], 1 }
 0x426   :  { %329 = vsyncpa [#allocation9], 1 }
 0x427   :  { %330 = vsyncpa [#allocation4], 1 }

</bundles_post_ra>
